<compile_context>
chip_gen: v7x
topology: tpu7x:2x2x1
jax: 0.10.0
libtpu: 0.0.40
codegen_flags: <defaults>
</compile_context>

<pallas_src>
import jax
import jax.numpy as jnp
from jax.experimental import pallas as pl
from jax.experimental.pallas import tpu as pltpu


_GUARD = 20.0  # for x > 20, tanh(softplus(x)) == 1.0 at f32 precision
_LANE_CANDIDATES = (4096, 2048, 1024, 512, 256, 128)


def _mish_kernel(x_ref, o_ref):
    """mish(x) = x * tanh(softplus(x)) = x * n / (n + 2), with n = e^x (e^x + 2)."""
    xf = x_ref[...].astype(jnp.float32)        # f32 compute (mandatory on v5e for bf16)
    xs = jnp.minimum(xf, _GUARD)               # keep exp in range; clamped branch unused
    t = jnp.exp(xs)                            # single EUP transcendental
    num = t * (t + 2.0)
    den = num + 2.0
    inv = pl.reciprocal(den, approx=True)      # EUP slot (idle after the exp), not VALU
    inv = inv * (2.0 - den * inv)              # one Newton step -> ~f32 accuracy (2 cheap VALU ops)
    y = xf * (num * inv)
    o_ref[...] = jnp.where(xf > _GUARD, xf, y).astype(o_ref.dtype)


def _mish_jnp(x):
    """Pure-JAX reference / tiny-tail fallback."""
    xf = x.astype(jnp.float32)
    return (xf * jnp.tanh(jax.nn.softplus(xf))).astype(x.dtype)


def _vmem_capacity_bytes():
    try:
        cap = getattr(pltpu.get_tpu_info(), "vmem_capacity_bytes", None)
        if cap:
            return int(cap)
    except Exception:
        pass
    return 64 * 1024 * 1024  # conservative (v7x-sized) fallback


def _pick_lanes(n, sub_min):
    """Widest lane count (multiple of 128) dividing n that still leaves enough rows
    for multiple grid steps; falls back to the widest divisor."""
    cands = [c for c in _LANE_CANDIDATES if n % c == 0]
    for min_rows in (4 * sub_min, 2 * sub_min, sub_min, 1):
        for c in cands:  # widest first
            if n // c >= min_rows:
                return c
    return cands[0]


def _mish_bulk(x_flat, *, donate=False):
    """Run the Pallas kernel on a 1-D array whose length is a multiple of 128."""
    n = x_flat.shape[0]
    dtype = x_flat.dtype
    itemsize = jnp.dtype(dtype).itemsize
    # dtype-dependent minimum sublane tiling (8 for 32-bit, 16 for 16-bit, 32 for 8-bit)
    sub_min = {4: 8, 2: 16, 1: 32}.get(itemsize, 8)

    C = _pick_lanes(n, sub_min)
    rows = n // C
    x2d = x_flat.reshape(rows, C)

    vmem_cap = _vmem_capacity_bytes()
    # ~8 MiB blocks (near the HBM roofline), but keep the 4x pipeline footprint
    # (in + out, double-buffered) comfortably inside VMEM even on v7x (64 MiB).
    target_block_bytes = min(8 << 20, vmem_cap // 8)

    tr = max(target_block_bytes // (C * itemsize), sub_min)
    tr = (tr // sub_min) * sub_min
    # Prefer >= 4 grid steps (pipelining) and never grid=(1,) when rows permit
    # (>= 2 steps so both v7x TensorCores get work on the "parallel" axis).
    if rows >= 4 * sub_min:
        tr = min(tr, ((rows // 4) // sub_min) * sub_min)
    elif rows >= 2 * sub_min:
        tr = min(tr, ((rows // 2) // sub_min) * sub_min)
    if tr >= rows:
        tr = rows  # full-extent block is always a legal block shape
    grid = (pl.cdiv(rows, tr),)  # ragged last block handled/masked by Pallas

    block_bytes = tr * C * itemsize
    vmem_limit = max(4 * block_bytes + (4 << 20), 32 << 20)
    vmem_limit = int(min(vmem_limit, max((3 * vmem_cap) // 4, 16 << 20)))

    extra = {}
    if donate:
        extra["input_output_aliases"] = {0: 0}

    out2d = pl.pallas_call(
        _mish_kernel,
        out_shape=jax.ShapeDtypeStruct((rows, C), dtype),
        grid_spec=pltpu.PrefetchScalarGridSpec(
            num_scalar_prefetch=0,
            grid=grid,
            in_specs=[pl.BlockSpec((tr, C), lambda i: (i, 0))],
            out_specs=pl.BlockSpec((tr, C), lambda i: (i, 0)),
        ),
        compiler_params=pltpu.CompilerParams(
            dimension_semantics=("parallel",),
            vmem_limit_bytes=vmem_limit,
        ),
        cost_estimate=pl.CostEstimate(
            flops=10 * n,
            transcendentals=2 * n,           # exp + approx reciprocal
            bytes_accessed=2 * n * itemsize,
        ),
        **extra,
    )(x2d)
    return out2d.reshape(-1)


def mish(x, *, donate=False):
    """Elementwise Mish. Any shape (e.g. NCHW); preserves shape and dtype."""
    orig_shape = x.shape
    n = x.size
    if n == 0:
        return x

    x_flat = jnp.ravel(x)
    rem = n % 128
    bulk = n - rem

    if bulk == 0:
        # Tiny (< 128 elements): not worth a kernel launch.
        return _mish_jnp(x_flat).reshape(orig_shape)

    out_bulk = _mish_bulk(x_flat[:bulk] if rem else x_flat, donate=donate)

    if rem:
        # Handle the (<128-element) tail with plain jnp instead of padding the whole
        # flat array and slicing it back (which cost two extra full-array HBM passes).
        out_tail = _mish_jnp(x_flat[bulk:])
        out_flat = jnp.concatenate([out_bulk, out_tail])
    else:
        out_flat = out_bulk
    return out_flat.reshape(orig_shape)


if __name__ == "__main__":
    key = jax.random.PRNGKey(0)

    # Primary test: NCHW input like the PyTorch module would see.
    x = jax.random.normal(key, (2, 4, 16, 16), dtype=jnp.float32)
    y = jax.block_until_ready(mish(x))
    y_ref = _mish_jnp(x)
    assert y.shape == x.shape and y.dtype == x.dtype
    assert jnp.allclose(y, y_ref, atol=1e-5, rtol=1e-4), "mismatch vs reference (f32)"

    # Ragged size (exercises bulk + tail split) with large magnitudes
    # (exercises the exp-overflow guard).
    x2 = 15.0 * jax.random.normal(jax.random.PRNGKey(1), (2, 3, 17, 19), dtype=jnp.float32)
    y2 = jax.block_until_ready(mish(x2))
    y2_ref = _mish_jnp(x2)
    assert y2.shape == x2.shape and y2.dtype == x2.dtype
    assert jnp.allclose(y2, y2_ref, atol=1e-5, rtol=1e-4), "mismatch (ragged/large-x)"

    # bf16 path (sub_min = 16, f32 internal compute).
    x3 = jax.random.normal(jax.random.PRNGKey(2), (2, 4, 16, 16), dtype=jnp.bfloat16)
    y3 = jax.block_until_ready(mish(x3))
    y3_ref = _mish_jnp(x3)
    assert y3.shape == x3.shape and y3.dtype == x3.dtype
    assert jnp.allclose(y3.astype(jnp.float32), y3_ref.astype(jnp.float32),
                        atol=2e-2, rtol=2e-2), "mismatch (bf16)"

    print("KERNEL_OK")
</pallas_src>

<mosaic_0001>
module attributes {stable_mosaic.version = 11 : i64} {
  func.func @_mish_kernel(%arg0: i32, %arg1: memref<8x128xf32, #tpu.memory_space<vmem>>, %arg2: memref<8x128xf32, #tpu.memory_space<vmem>>) attributes {dimension_semantics = [#tpu.dimension_semantics<parallel>], iteration_bounds = array<i64: 2>, scalar_prefetch = 0 : i64, scratch_operands = 0 : i64, tpu.core_type = #tpu.core_type<tc>, window_params = [{transform_indices = @transform_0, window_bounds = array<i64: 8, 128>}, {transform_indices = @transform_1, window_bounds = array<i64: 8, 128>}]} {
    %c0 = arith.constant 0 : index
    %c0_0 = arith.constant 0 : index
    %0 = vector.load %arg1[%c0, %c0_0] : memref<8x128xf32, #tpu.memory_space<vmem>>, vector<8x128xf32>
    %cst = arith.constant 2.000000e+01 : f32
    %1 = vector.broadcast %cst : f32 to vector<8x128xf32>
    %2 = arith.minimumf %0, %1 : vector<8x128xf32>
    %3 = math.exp %2 : vector<8x128xf32>
    %cst_1 = arith.constant 2.000000e+00 : f32
    %4 = vector.broadcast %cst_1 : f32 to vector<8x128xf32>
    %5 = arith.addf %3, %4 : vector<8x128xf32>
    %6 = arith.mulf %3, %5 : vector<8x128xf32>
    %cst_2 = arith.constant 2.000000e+00 : f32
    %7 = vector.broadcast %cst_2 : f32 to vector<8x128xf32>
    %8 = arith.addf %6, %7 : vector<8x128xf32>
    %9 = tpu.reciprocal %8 {approx = true} : vector<8x128xf32> -> vector<8x128xf32>
    %10 = arith.mulf %8, %9 : vector<8x128xf32>
    %cst_3 = arith.constant 2.000000e+00 : f32
    %11 = vector.broadcast %cst_3 : f32 to vector<8x128xf32>
    %12 = arith.subf %11, %10 : vector<8x128xf32>
    %13 = arith.mulf %9, %12 : vector<8x128xf32>
    %14 = arith.mulf %6, %13 : vector<8x128xf32>
    %15 = arith.mulf %0, %14 : vector<8x128xf32>
    %cst_4 = arith.constant 2.000000e+01 : f32
    %16 = vector.broadcast %cst_4 : f32 to vector<8x128xf32>
    %17 = arith.cmpf ogt, %0, %16 : vector<8x128xf32>
    %18 = arith.select %17, %0, %15 : vector<8x128xi1>, vector<8x128xf32>
    %c0_5 = arith.constant 0 : index
    %c0_6 = arith.constant 0 : index
    %19 = vector.load %arg2[%c0_5, %c0_6] : memref<8x128xf32, #tpu.memory_space<vmem>>, vector<8x128xf32>
    tpu.vector_store %arg2[%c0_5, %c0_6], %18 {strides = array<i32>} : memref<8x128xf32, #tpu.memory_space<vmem>>, vector<8x128xf32>,
    return
  }
  func.func @transform_0(%arg0: i32) -> (i32, i32) {
    %c0_i32 = arith.constant 0 : i32
    %c0_i32_0 = arith.constant 0 : i32
    return %arg0, %c0_i32 : i32, i32
  }
  func.func @transform_1(%arg0: i32) -> (i32, i32) {
    %c0_i32 = arith.constant 0 : i32
    %c0_i32_0 = arith.constant 0 : i32
    return %arg0, %c0_i32 : i32, i32
  }
}

</mosaic_0001>

<bundles_post_ra>
// kernel: tpu_custom_call.1
= control target key start
LH: loop header
LB: loop body
LE: loop exit
PB: predicated region body
PF: predicated region fallthrough
CT: control target
= control target key end

     0   :  { %6 = vsyncpa [#allocation3], 0  ;;  %s565_s0 = inlined_call_operand.hbm [shape: f32[16,128], index: 0, kind: input, shape index: {}]   ;;  %s566_s1 = inlined_call_operand.hbm [shape: f32[16,128], index: 1, kind: output, shape index: {}]  }
   0x1   :  { %8 = vsyncpa [#allocation3 + $0x1], 0 }
   0x2   :  { %9 = vsyncpa [#allocation4], 0 }
   0x3   :  { %11 = vsyncpa [#allocation4 + $0x1], 0  ;;  %s404_s6 = smov 0   ;;  %s406_s7 = smov 0  }
   0x4   :  { %s408_s8 = smov 0   ;;  %s410_s9 = smov 0  }
   0x5 LB: > { %s425_s10 = sadd.s32 4294967295, %s390_s9   ;;  %s232_s11 = sadd.s32 4294967294, %s390_s9   ;;  %s390_s9 = sphi %s410_s9, %s581_s9   ;;  %s386_s8 = sphi %s408_s8, %s580_s8   ;;  %s382_s7 = sphi %s406_s7, %s579_s7   ;;  %s378_s6 = sphi %s404_s6, %s578_s6  }
   0x6   : > { %s429_s12 = sadd.s32 1, %s390_s9   ;;  %s24_s13 = sadd.s32 1, %s386_s8 }
   0x7   : > { %s21_s14 = ssub.s32 %s390_s9, %s429_s12  ;;  %p31_p0 = scmp.ne.s32.totalorder %s386_s8, %s382_s7 }
   0x8   : > { %p22_p1 = scmp.eq.s32.totalorder %s21_s14, 0  ;;  %p32_p2 = scmp.eq.s32.totalorder %s390_s9, 0 }
   0x9   : > { %p37_p3 = scmp.ne.s32.totalorder %s382_s7, %s378_s6  ;;  %p38_p4 = scmp.eq.s32.totalorder %s425_s10, 0 }
   0xa   : > { %s441_s15 = scalar_select %p22_p1, %s386_s8, %s24_s13  }
   0xb   : > { %p443_p5 = por %p32_p2, %p31_p0  ;;  %p447_p6 = por %p38_p4, %p37_p3 }
   0xc   : > { %p61_p7 = scmp.eq.s32.totalorder %s425_s10, 1  ;;  %p67_p8 = scmp.eq.s32.totalorder %s232_s11, 1 }
   0xd   : > { %p256_p10 = scmp.lt.s32.totalorder %s390_s9, 2  ;;  %s87_s20 = sand.u32 1, %s386_s8  }
   0xe   : > { %p454_p11 = por %p61_p7, %p31_p0  ;;  %p458_p12 = por %p67_p8, %p37_p3 }
   0xf   : > { %s236_s21 = sshll.u32 %s390_s9, 7  ;;  %s235_s22 = sshll.u32 %s87_s20, 3 }
  0x10   : > { %s570_s18 = scalar_select %p454_p11, 1, 0 }
  0x11   : > { %s571_s19 = scalar_select %p458_p12, 1, 0 }
  0x12   : > { %s467_s25 = scalar_lea.hbm %s565_s0, %s236_s21  ;;  %s91_s26 = scalar_lea.vmem [#allocation2], %s235_s22 }
  0x13   : > { %s98_s27 = sshll.u32 %s91_s26, 4  ;;  %p471_p13 = pnand %p256_p10, %p443_p5  ;;  %s475_s27 = int_to_ptr.vmem [resolvable:$true] %s98_s27 }
  0x14   : > { %s88_s29 = scalar_lea.sflag [#allocation3], %s87_s20  ;;  %s294_s30 = scalar_lea.hbm %s467_s25, 128 }
  0x15   : > { %p295_p2 = scmp.ne.s32.totalorder %s467_s25, %s294_s30  ;;  %p296_p3 = pneg %p471_p13 }
  0x16   : > { %s299_s4 = scalar_lea.hbm %s565_s0, 256  ;;  %p300_p5 = scmp.lt.u32.totalorder %s467_s25, %s565_s0 }
  0x17   : > { %p297_p4 = pnand %p296_p3, %p295_p2  ;;  %p301_p8 = scmp.lt.u32.totalorder %s299_s4, %s294_s30 }
  0x18   : > { %p303_p9 = scmp.lt.u32.totalorder %s294_s30, %s467_s25 }
  0x19   : > { %p298_p7 = pneg %p297_p4  ;;  %p302_p10 = por %p301_p8, %p300_p5 }
  0x1b   : > { %p304_p0 = por %p303_p9, %p302_p10 }
  0x1d   : > { %p305_p1 = pnand %p304_p0, %p298_p7 }
  0x1f   : > { %308 = shalt.err (!%p305_p1)
}
  0x20   : > { %s309_s13 = scalar_lea.vmem %s475_s27, 128  ;;  %s392_s14 = smov [#allocation2]  }
  0x21   : > { %p310_p2 = scmp.ne.s32.totalorder %s475_s27, %s309_s13  ;;  %s314_s16 = sshll.u32 %s392_s14, 4  ;;  %s315_s16 = int_to_ptr.vmem [resolvable:$false] %s314_s16 }
  0x22   : > { %s316_s20 = scalar_lea.vmem %s315_s16, 256  ;;  %p317_p11 = scmp.lt.s32.totalorder %s475_s27, %s315_s16 }
  0x23   : > { %p312_p4 = pnand %p310_p2, %p296_p3  ;;  %p318_p5 = scmp.lt.s32.totalorder %s316_s20, %s309_s13 }
  0x25   : > { %p313_p12 = pneg %p312_p4  ;;  %p319_p8 = por %p318_p5, %p317_p11 }
  0x27   : > { %p320_p9 = pnand %p319_p8, %p313_p12 }
  0x29   : > { %323 = shalt.err (!%p320_p9)
}
  0x2a   : > { %251 = dma.hbm_to_vmem [thread:$0]  (!%p471_p13), %s467_s25, 128, %s475_s27, %s88_s29  }
  0x2b   : > { %p573_p0 = scmp.lt.s32.totalorder %s390_s9, 3  ;;  %p574_p1 = scmp.ge.s32.totalorder %s390_s9, 1 }
  0x2d   : > { %p104_p3 = pnand %p574_p1, %p573_p0 }
  0x2e   : > { %s509_s21 = sand.u32 (!%p104_p3), 1, %s382_s7  }
  0x2f   : > { %107 = sbr.rel (%p104_p3) target bundleno = 113 (0x71), region = 24  ;;  %s238_s22 = sshll.u32 (!%p104_p3), %s509_s21, 3 }
  0x30   : > { %s110_s23 = scalar_lea.sflag (!%p104_p3), [#allocation3], %s509_s21  ;;  %s113_s24 = scalar_lea.vmem (!%p104_p3), [#allocation2], %s238_s22 }
  0x36   : > { %369 = dma.done.wait (%p447_p6), %s110_s23, 128  }
  0x37   : > { %371 = vsyncadd (%p447_p6), %s110_s23, 4294967168  ;;  %v132_v0 = vld [vmem:[%s113_s24] sm:$0xff]  ;;  %s131_s25 = scalar_lea.vmem [#allocation5], %s238_s22  ;;  %s241_s26 = sshll.u32 %s425_s10, 7 }
  0x38   : > { %v133_v1 = vmin.f32 %v132_v0, 20.0  ;;  %s162_s17 = sshll.u32 %s131_s25, 4  ;;  %vm145_vm0 = vcmp.gt.f32.partialorder %v132_v0, 20.0  ;;  %s523_s29 = scalar_lea.hbm %s566_s1, %s241_s26  ;;  %s518_s17 = int_to_ptr.vmem [resolvable:$true] %s162_s17 }
  0x39   : > { %s149_s30 = scalar_lea.sflag [#allocation4], %s509_s21  ;;  %s324_s2 = scalar_lea.vmem %s518_s17, 128 }
  0x3a   : > { %v134_v2 = vmul.f32 1.442695, %v133_v1  ;;  %p325_p6 = scmp.ne.s32.totalorder %s518_s17, %s324_s2  ;;  %p575_p11 = scmp.ne.s32.totalorder %s570_s18, 0 }
  0x3b   : > { %s393_s10 = smov [#allocation5]  }
  0x3c   : > { %290 = vpow2.f32 %v134_v2  ;;  %p326_p12 = pnand %p325_p6, %p575_p11  ;;  %s328_s3 = sshll.u32 %s393_s10, 4  ;;  %s329_s3 = int_to_ptr.vmem [resolvable:$false] %s328_s3 }
  0x3d   : > { %s330_s4 = scalar_lea.vmem %s329_s3, 256  ;;  %p331_p7 = scmp.lt.s32.totalorder %s518_s17, %s329_s3 }
  0x3e   : > { %p327_p13 = pneg %p326_p12  ;;  %p332_p10 = scmp.lt.s32.totalorder %s330_s4, %s324_s2 }
  0x40   : > { %p333_p2 = por %p332_p10, %p331_p7 }
  0x42   : > { %p334_p4 = pnand %p333_p2, %p327_p13 }
  0x46   : > { %v291_v3 = vpop.eup %290 }
  0x47   : > { %v136_v4 = vadd.f32 2.0, %v291_v3 }
  0x49   : > { %v137_v5 = vmul.f32 %v291_v3, %v136_v4 }
  0x4b   : > { %v138_v6 = vadd.f32 2.0, %v137_v5 }
  0x4d   : > { %292 = vrcp.f32 %v138_v6 }
  0x57   : > { %v293_v7 = vpop.eup %292 }
  0x58   : > { %v140_v8 = vmul.f32 %v293_v7, %v138_v6 }
  0x5a   : > { %v141_v9 = vsub.f32 2.0, %v140_v8 }
  0x5c   : > { %v142_v10 = vmul.f32 %v293_v7, %v141_v9 }
  0x5e   : > { %v143_v11 = vmul.f32 %v142_v10, %v137_v5 }
  0x60   : > { %v144_v12 = vmul.f32 %v143_v11, %v132_v0 }
  0x62   : > { %v146_v13 = vsel %vm145_vm0, %v132_v0, %v144_v12 }
  0x63   : > { %147 = vst [vmem:[%s131_s25] sm:$0xff] %v146_v13 }
  0x64   : > { %337 = shalt.err (!%p334_p4)
}
  0x65   : > { %s338_s5 = scalar_lea.hbm %s523_s29, 128  ;;  %s342_s14 = scalar_lea.hbm %s566_s1, 256 }
  0x66   : > { %p339_p5 = scmp.ne.s32.totalorder %s523_s29, %s338_s5  ;;  %p343_p0 = scmp.lt.u32.totalorder %s523_s29, %s566_s1 }
  0x67   : > { %p344_p1 = scmp.lt.u32.totalorder %s342_s14, %s338_s5  ;;  %p346_p6 = scmp.lt.u32.totalorder %s338_s5, %s523_s29 }
  0x68   : > { %p340_p8 = pnand %p339_p5, %p575_p11 }
  0x69   : > { %p345_p3 = por %p344_p1, %p343_p0 }
  0x6a   : > { %p341_p9 = pneg %p340_p8 }
  0x6b   : > { %p347_p12 = por %p346_p6, %p345_p3 }
  0x6d   : > { %p348_p13 = pnand %p347_p12, %p341_p9 }
  0x6f   : > { %351 = shalt.err (!%p348_p13)
}
  0x70   : > { %246 = dma.vmem_to_hbm [thread:$0]  (%p575_p11), %s518_s17, 128, %s523_s29, %s149_s30  }
  0x71 PF: > { %s174_s21 = sand.u32 1, %s378_s6   ;;  %p576_p7 = scmp.ne.s32.totalorder %s571_s19, 0 }
  0x72   : > { %p577_p10 = scmp.ge.s32.totalorder %s390_s9, 2  ;;  %s175_s22 = scalar_lea.sflag [#allocation4], %s174_s21 }
  0x74   : > { %p253_p2 = pnand %p577_p10, %p576_p7 }
  0x76   : > { %373 = dma.done.wait (!%p253_p2), %s175_s22, 128  }
  0x77   : > { %375 = vsyncadd (!%p253_p2), %s175_s22, 4294967168  ;;  %p14_p4 = scmp.ge.s32.totalorder %s429_s12, 4   ;;  %s578_s6 = smov %s382_s7 }
  0x78   : > { %s579_s7 = smov %s386_s8  ;;  %s580_s8 = smov %s441_s15 }
  0x79   : > { %s581_s9 = smov %s429_s12  ;;  %16 = sbr.rel (!%p14_p4) target bundleno = 5 (0x5), region = 69 }
  0x80   :  { %180 = vsyncpa [#allocation3], 1 }
  0x81   :  { %182 = vsyncpa [#allocation3 + $0x1], 1 }
  0x82   :  { %183 = vsyncpa [#allocation4], 1 }
  0x83   :  { %185 = vsyncpa [#allocation4 + $0x1], 1 }

</bundles_post_ra>
